<compile_context>
chip_gen: v6e
topology: v6e:2x2x1
jax: 0.10.0
libtpu: 0.0.40
codegen_flags: <defaults>
</compile_context>

<pallas_src>
import jax
import jax.numpy as jnp
from jax import lax
from jax.experimental import pallas as pl
from jax.experimental.pallas import tpu as pltpu  # noqa: F401  (TPU backend)

# ---- config (mirrors the shapes implied by BiMamba.__init__) ----
D_MODEL = 8        # config.d_model (RevIN num_features) -- power of two
SEQ_LEN = 16       # config.seq_len
N_CLASSES = 4      # config.n_classes -- power of two
D_PRED = 2         # config.d_pred
BATCH = 2
EPS = 1e-5         # RevIN eps

F_FLAT = SEQ_LEN * D_MODEL            # 128: lane-dense flattened width (== nn.Flatten output)
C_OUT = D_PRED * N_CLASSES            # 8:   linear head width
N_SHIFT = N_CLASSES.bit_length() - 1  # lane // N_CLASSES via right shift
assert D_MODEL & (D_MODEL - 1) == 0, "in-kernel f%D trick assumes power-of-two d_model"
assert N_CLASSES & (N_CLASSES - 1) == 0, "in-kernel grouping assumes power-of-two n_classes"

# parameter-slab row layout: ONE (P_ROWS, F_FLAT) input DMA carries every parameter
ROW_W0 = 0                 # rows [0, C_OUT): nn.Linear weight in its native (out, in) layout
ROW_GAMMA = C_OUT          # RevIN affine_weight broadcast to the lane-dense flat layout
ROW_BETA = C_OUT + 1       # RevIN affine_bias, same layout
ROW_BIAS = C_OUT + 2       # linear bias in lanes [0, C_OUT)
P_ROWS = 16                # pad to a whole number of (8,128) sublane tiles


# ----------------------- fused forward kernel (single invocation) -----------------------
def bimamba_fused_kernel(xf_ref, p_ref, out_ref):
    # xf_ref:  (B, F)      flattened input, F = L*D (row-major, identical to nn.Flatten)
    # p_ref:   (P_ROWS, F) parameter slab (see ROW_* layout above)
    # out_ref: (B, 2*C)    merged output: lanes [0,C) = logits, lanes [C,2C) = pseudo_probs
    inv_L = jnp.float32(1.0 / SEQ_LEN)
    xf = xf_ref[...]                                        # (B, F) lane-dense activations

    # ---- parameter slab rows (one DMA for all parameters) ----
    w_cf = p_ref[ROW_W0:ROW_W0 + C_OUT, :]                  # (C, F) nn.Linear weight (out, in)
    gamma_f = p_ref[ROW_GAMMA:ROW_GAMMA + 1, :]             # (1, F) lane-dense RevIN gamma
    beta_f = p_ref[ROW_BETA:ROW_BETA + 1, :]                # (1, F) lane-dense RevIN beta
    bias = p_ref[ROW_BIAS:ROW_BIAS + 1, 0:C_OUT]            # (1, C) linear bias

    # ---- constant 0/1 selection matrices generated in-kernel (no HBM traffic) ----
    # bct[f, d] = (f mod D == d): per-feature gather over the seq axis
    f_row = lax.broadcasted_iota(jnp.int32, (F_FLAT, D_MODEL), 0)
    d_col = lax.broadcasted_iota(jnp.int32, (F_FLAT, D_MODEL), 1)
    bct = (jnp.bitwise_and(f_row, D_MODEL - 1) == d_col).astype(jnp.float32)   # (F, D)
    # bc = bct^T, generated directly (avoids an XLU transpose)
    d_row = lax.broadcasted_iota(jnp.int32, (D_MODEL, F_FLAT), 0)
    f_col = lax.broadcasted_iota(jnp.int32, (D_MODEL, F_FLAT), 1)
    bc = (jnp.bitwise_and(f_col, D_MODEL - 1) == d_row).astype(jnp.float32)    # (D, F)

    # ---- RevIN 'norm': per-(batch, feature) stats over the seq axis ----
    # Two INDEPENDENT stats dots (issue back-to-back -> one serial MXU stage).
    sum_x = jnp.dot(xf, bct, preferred_element_type=jnp.float32)               # (B, D)
    sum_x2 = jnp.dot(xf * xf, bct, preferred_element_type=jnp.float32)         # (B, D)
    mean = sum_x * inv_L
    var = sum_x2 * inv_L - mean * mean           # ddof=0 (torch.var unbiased=False)
    inv_std = lax.rsqrt(var + EPS)               # EUP

    # Broadcast stats back to the lane-dense layout: two independent dots (one MXU stage).
    mean_f = jnp.dot(mean, bc, preferred_element_type=jnp.float32)             # (B, F)
    inv_f = jnp.dot(inv_std, bc, preferred_element_type=jnp.float32)           # (B, F)
    # normalized activations stay (B, F): lane-dense, never written back to HBM
    xn = (xf - mean_f) * (inv_f * gamma_f) + beta_f                            # (B, F)

    # ---- patching (config.patching is None) / encoder stack: identity ----
    # TODO(synk): BiMambaPlusEncoder / BiMamba4TSEncoder / BiMambaFusionEncoder class
    # definitions are not provided in the module source; the e_layers stack is treated
    # as a shape-preserving identity here.

    # ---- Flatten + Linear head: one K = L*D contraction against the (C, F) weight rows ----
    logits = lax.dot_general(xn, w_cf, (((1,), (1,)), ((), ())),
                             preferred_element_type=jnp.float32) + bias        # (B, C)

    # ---- grouped softmax over each n_classes-wide group, with a PER-GROUP max ----
    lane = lax.broadcasted_iota(jnp.int32, (BATCH, C_OUT), 1)
    group = jnp.right_shift(lane, N_SHIFT)                  # lane // N_CLASSES
    neg_big = jnp.float32(-1e30)
    gmax = jnp.zeros_like(logits)
    for g in range(D_PRED):                                 # D_PRED is a tiny static constant
        in_g = group == g
        mg = jnp.max(jnp.where(in_g, logits, neg_big), axis=1, keepdims=True)  # (B, 1)
        gmax = jnp.where(in_g, mg, gmax)
    e = jnp.exp(logits - gmax)
    # block-diagonal ones (group-sum) matrix, generated in-kernel
    gi = lax.broadcasted_iota(jnp.int32, (C_OUT, C_OUT), 0)
    gj = lax.broadcasted_iota(jnp.int32, (C_OUT, C_OUT), 1)
    gsum = (jnp.right_shift(gi, N_SHIFT) == jnp.right_shift(gj, N_SHIFT)).astype(jnp.float32)
    denom = jnp.dot(e, gsum, preferred_element_type=jnp.float32)               # per-group sums
    probs = e * pl.reciprocal(denom, approx=True)           # denom >= 1, approx recip is safe

    # ---- single merged output buffer: [logits | probs] along lanes (one output DMA) ----
    out_ref[:, 0:C_OUT] = logits.astype(out_ref.dtype)
    out_ref[:, C_OUT:2 * C_OUT] = probs.astype(out_ref.dtype)


def bimamba_forward(x, pslab):
    B, L, D = x.shape
    F = L * D
    C = D_PRED * N_CLASSES
    xf = x.reshape(B, F)                   # free metadata reshape (row-major == nn.Flatten)

    flops = (2 * B * F * D) * 2 + (2 * B * D * F) * 2 + 2 * B * F * C + 2 * B * C * C + 12 * B * F
    cost = pl.CostEstimate(
        flops=int(flops),
        transcendentals=int(B * (D + 2 * C)),                  # rsqrt + exp + approx recip
        bytes_accessed=int(4 * (B * F + P_ROWS * F + B * 2 * C)),
    )

    out = pl.pallas_call(
        bimamba_fused_kernel,
        out_shape=jax.ShapeDtypeStruct((B, 2 * C), jnp.float32),
        cost_estimate=cost,
    )(xf, pslab)

    # reshape glue (row-major, same as torch .reshape((B, d_pred, n_classes)))
    logits = out[:, :C].reshape(B, D_PRED, N_CLASSES)
    probs = out[:, C:].reshape(B, D_PRED, N_CLASSES)
    return probs, logits


def build_param_slab(lin_w, lin_b, gamma, beta):
    # Pack every parameter into one (P_ROWS, F_FLAT) f32 slab -> a single input DMA.
    pslab = jnp.zeros((P_ROWS, F_FLAT), jnp.float32)
    pslab = pslab.at[ROW_W0:ROW_W0 + C_OUT, :].set(lin_w)               # (C, F) weight
    pslab = pslab.at[ROW_GAMMA, :].set(jnp.tile(gamma, SEQ_LEN))        # gamma_f[l*D+d] = gamma[d]
    pslab = pslab.at[ROW_BETA, :].set(jnp.tile(beta, SEQ_LEN))          # beta_f[l*D+d]  = beta[d]
    pslab = pslab.at[ROW_BIAS, 0:C_OUT].set(lin_b)                      # bias in lanes [0, C)
    return pslab


# ---------------------------- pure-JAX reference ----------------------------
def reference(x, lin_w, lin_b, gamma, beta):
    mean = jnp.mean(x, axis=1, keepdims=True)
    var = jnp.var(x, axis=1, keepdims=True)            # ddof=0 (unbiased=False)
    xn = (x - mean) / jnp.sqrt(var + EPS)
    xn = xn * gamma + beta
    xf = xn.reshape(x.shape[0], -1)
    logits = xf @ lin_w.T + lin_b
    logits3 = logits.reshape(x.shape[0], D_PRED, N_CLASSES)
    probs = jax.nn.softmax(logits3, axis=2)
    return probs, logits3


if __name__ == "__main__":
    key = jax.random.PRNGKey(0)
    kx, kw, kb, kg, kbe = jax.random.split(key, 5)

    # deterministic example input: (batch, seq_len, d_model)
    x = jax.random.normal(kx, (BATCH, SEQ_LEN, D_MODEL), dtype=jnp.float32)

    # deterministic parameters
    lin_w = 0.05 * jax.random.normal(kw, (C_OUT, F_FLAT), jnp.float32)      # nn.Linear (out, in)
    lin_b = 0.05 * jax.random.normal(kb, (C_OUT,), jnp.float32)
    gamma = 1.0 + 0.1 * jax.random.normal(kg, (D_MODEL,), jnp.float32)      # RevIN affine_weight
    beta = 0.1 * jax.random.normal(kbe, (D_MODEL,), jnp.float32)            # RevIN affine_bias

    pslab = build_param_slab(lin_w, lin_b, gamma, beta)

    probs, logits = bimamba_forward(x, pslab)
    jax.block_until_ready((probs, logits))

    probs_ref, logits_ref = reference(x, lin_w, lin_b, gamma, beta)
    assert probs.shape == (BATCH, D_PRED, N_CLASSES)
    assert logits.shape == (BATCH, D_PRED, N_CLASSES)
    assert jnp.allclose(logits, logits_ref, atol=1e-4, rtol=1e-4)
    # probs use the approximate EUP reciprocal for the softmax denominator -> slightly
    # looser (but still tight in absolute terms for values in [0, 1]) tolerance.
    assert jnp.allclose(probs, probs_ref, atol=2e-3, rtol=2e-3)

    print("KERNEL_OK")
</pallas_src>

<mosaic_0001>
module attributes {stable_mosaic.version = 11 : i64} {
  func.func @bimamba_fused_kernel(%arg0: memref<2x128xf32, #tpu.memory_space<vmem>>, %arg1: memref<16x128xf32, #tpu.memory_space<vmem>>, %arg2: memref<2x16xf32, #tpu.memory_space<vmem>>) attributes {dimension_semantics = [], scalar_prefetch = 0 : i64, scratch_operands = 0 : i64, tpu.core_type = #tpu.core_type<tc>} {
    %c0 = arith.constant 0 : index
    %c0_0 = arith.constant 0 : index
    %0 = vector.load %arg0[%c0, %c0_0] : memref<2x128xf32, #tpu.memory_space<vmem>>, vector<2x128xf32>
    %c0_1 = arith.constant 0 : index
    %c0_2 = arith.constant 0 : index
    %1 = vector.load %arg1[%c0_1, %c0_2] : memref<16x128xf32, #tpu.memory_space<vmem>>, vector<8x128xf32>
    %c8 = arith.constant 8 : index
    %c0_3 = arith.constant 0 : index
    %2 = vector.load %arg1[%c8, %c0_3] : memref<16x128xf32, #tpu.memory_space<vmem>>, vector<1x128xf32>
    %c9 = arith.constant 9 : index
    %c0_4 = arith.constant 0 : index
    %3 = vector.load %arg1[%c9, %c0_4] : memref<16x128xf32, #tpu.memory_space<vmem>>, vector<1x128xf32>
    %c10 = arith.constant 10 : index
    %c0_5 = arith.constant 0 : index
    %4 = vector.load %arg1[%c10, %c0_5] : memref<16x128xf32, #tpu.memory_space<vmem>>, vector<1x8xf32>
    %5 = tpu.iota {dimensions = array<i32: 0>} : vector<128x8xi32>
    %6 = tpu.iota {dimensions = array<i32: 1>} : vector<128x8xi32>
    %c7_i32 = arith.constant 7 : i32
    %7 = vector.broadcast %c7_i32 : i32 to vector<128x8xi32>
    %8 = arith.andi %5, %7 : vector<128x8xi32>
    %9 = arith.cmpi eq, %8, %6 : vector<128x8xi32>
    %10 = arith.extui %9 : vector<128x8xi1> to vector<128x8xi32>
    %11 = arith.sitofp %10 : vector<128x8xi32> to vector<128x8xf32>
    %12 = tpu.iota {dimensions = array<i32: 0>} : vector<8x128xi32>
    %13 = tpu.iota {dimensions = array<i32: 1>} : vector<8x128xi32>
    %c7_i32_6 = arith.constant 7 : i32
    %14 = vector.broadcast %c7_i32_6 : i32 to vector<8x128xi32>
    %15 = arith.andi %13, %14 : vector<8x128xi32>
    %16 = arith.cmpi eq, %15, %12 : vector<8x128xi32>
    %17 = arith.extui %16 : vector<8x128xi1> to vector<8x128xi32>
    %18 = arith.sitofp %17 : vector<8x128xi32> to vector<8x128xf32>
    %cst = arith.constant dense<0.000000e+00> : vector<2x8xf32>
    %19 = tpu.matmul %0, %11, %cst {dimension_numbers = #tpu.dot_dimension_numbers<[1], [0], [0], [1], [0, 0, 1, 1], [], []>} : vector<2x128xf32>, vector<128x8xf32>, vector<2x8xf32> -> vector<2x8xf32>
    %20 = arith.mulf %0, %0 : vector<2x128xf32>
    %cst_7 = arith.constant dense<0.000000e+00> : vector<2x8xf32>
    %21 = tpu.matmul %20, %11, %cst_7 {dimension_numbers = #tpu.dot_dimension_numbers<[1], [0], [0], [1], [0, 0, 1, 1], [], []>} : vector<2x128xf32>, vector<128x8xf32>, vector<2x8xf32> -> vector<2x8xf32>
    %cst_8 = arith.constant 6.250000e-02 : f32
    %22 = vector.broadcast %cst_8 : f32 to vector<2x8xf32>
    %23 = arith.mulf %19, %22 : vector<2x8xf32>
    %cst_9 = arith.constant 6.250000e-02 : f32
    %24 = vector.broadcast %cst_9 : f32 to vector<2x8xf32>
    %25 = arith.mulf %21, %24 : vector<2x8xf32>
    %26 = arith.mulf %23, %23 : vector<2x8xf32>
    %27 = arith.subf %25, %26 : vector<2x8xf32>
    %cst_10 = arith.constant 9.99999974E-6 : f32
    %28 = vector.broadcast %cst_10 : f32 to vector<2x8xf32>
    %29 = arith.addf %27, %28 : vector<2x8xf32>
    %30 = math.rsqrt %29 : vector<2x8xf32>
    %cst_11 = arith.constant dense<0.000000e+00> : vector<2x128xf32>
    %31 = tpu.matmul %23, %18, %cst_11 {dimension_numbers = #tpu.dot_dimension_numbers<[1], [0], [0], [1], [0, 0, 1, 1], [], []>} : vector<2x8xf32>, vector<8x128xf32>, vector<2x128xf32> -> vector<2x128xf32>
    %cst_12 = arith.constant dense<0.000000e+00> : vector<2x128xf32>
    %32 = tpu.matmul %30, %18, %cst_12 {dimension_numbers = #tpu.dot_dimension_numbers<[1], [0], [0], [1], [0, 0, 1, 1], [], []>} : vector<2x8xf32>, vector<8x128xf32>, vector<2x128xf32> -> vector<2x128xf32>
    %33 = arith.subf %0, %31 : vector<2x128xf32>
    %34 = vector.broadcast %2 : vector<1x128xf32> to vector<2x128xf32>
    %35 = arith.mulf %32, %34 : vector<2x128xf32>
    %36 = arith.mulf %33, %35 : vector<2x128xf32>
    %37 = vector.broadcast %3 : vector<1x128xf32> to vector<2x128xf32>
    %38 = arith.addf %36, %37 : vector<2x128xf32>
    %cst_13 = arith.constant dense<0.000000e+00> : vector<2x8xf32>
    %39 = tpu.matmul %38, %1, %cst_13 {dimension_numbers = #tpu.dot_dimension_numbers<[1], [1], [0], [0], [0, 0, 1, 0], [], []>} : vector<2x128xf32>, vector<8x128xf32>, vector<2x8xf32> -> vector<2x8xf32>
    %40 = vector.broadcast %4 : vector<1x8xf32> to vector<2x8xf32>
    %41 = arith.addf %39, %40 : vector<2x8xf32>
    %42 = tpu.iota {dimensions = array<i32: 1>} : vector<2x8xi32>
    %c2_i32 = arith.constant 2 : i32
    %43 = vector.broadcast %c2_i32 : i32 to vector<2x8xi32>
    %44 = arith.shrsi %42, %43 : vector<2x8xi32>
    %cst_14 = arith.constant 0.000000e+00 : f32
    %45 = vector.broadcast %cst_14 : f32 to vector<2x8xf32>
    %c0_i32 = arith.constant 0 : i32
    %46 = vector.broadcast %c0_i32 : i32 to vector<2x8xi32>
    %47 = arith.cmpi eq, %44, %46 : vector<2x8xi32>
    %cst_15 = arith.constant -1.000000e+30 : f32
    %48 = vector.broadcast %cst_15 : f32 to vector<2x8xf32>
    %49 = arith.select %47, %41, %48 : vector<2x8xi1>, vector<2x8xf32>
    %cst_16 = arith.constant dense<0xFF800000> : vector<2xf32>
    %50 = vector.multi_reduction <maximumf>, %49, %cst_16 [1] : vector<2x8xf32> to vector<2xf32>
    %51 = vector.shape_cast %50 : vector<2xf32> to vector<2x1xf32>
    %52 = vector.shape_cast %51 : vector<2x1xf32> to vector<2x1xf32>
    %53 = vector.broadcast %52 : vector<2x1xf32> to vector<2x8xf32>
    %54 = arith.select %47, %53, %45 : vector<2x8xi1>, vector<2x8xf32>
    %c1_i32 = arith.constant 1 : i32
    %55 = vector.broadcast %c1_i32 : i32 to vector<2x8xi32>
    %56 = arith.cmpi eq, %44, %55 : vector<2x8xi32>
    %cst_17 = arith.constant -1.000000e+30 : f32
    %57 = vector.broadcast %cst_17 : f32 to vector<2x8xf32>
    %58 = arith.select %56, %41, %57 : vector<2x8xi1>, vector<2x8xf32>
    %cst_18 = arith.constant dense<0xFF800000> : vector<2xf32>
    %59 = vector.multi_reduction <maximumf>, %58, %cst_18 [1] : vector<2x8xf32> to vector<2xf32>
    %60 = vector.shape_cast %59 : vector<2xf32> to vector<2x1xf32>
    %61 = vector.shape_cast %60 : vector<2x1xf32> to vector<2x1xf32>
    %62 = vector.broadcast %61 : vector<2x1xf32> to vector<2x8xf32>
    %63 = arith.select %56, %62, %54 : vector<2x8xi1>, vector<2x8xf32>
    %64 = arith.subf %41, %63 : vector<2x8xf32>
    %65 = math.exp %64 : vector<2x8xf32>
    %66 = tpu.iota {dimensions = array<i32: 0>} : vector<8x8xi32>
    %67 = tpu.iota {dimensions = array<i32: 1>} : vector<8x8xi32>
    %c2_i32_19 = arith.constant 2 : i32
    %68 = vector.broadcast %c2_i32_19 : i32 to vector<8x8xi32>
    %69 = arith.shrsi %66, %68 : vector<8x8xi32>
    %c2_i32_20 = arith.constant 2 : i32
    %70 = vector.broadcast %c2_i32_20 : i32 to vector<8x8xi32>
    %71 = arith.shrsi %67, %70 : vector<8x8xi32>
    %72 = arith.cmpi eq, %69, %71 : vector<8x8xi32>
    %73 = arith.extui %72 : vector<8x8xi1> to vector<8x8xi32>
    %74 = arith.sitofp %73 : vector<8x8xi32> to vector<8x8xf32>
    %cst_21 = arith.constant dense<0.000000e+00> : vector<2x8xf32>
    %75 = tpu.matmul %65, %74, %cst_21 {dimension_numbers = #tpu.dot_dimension_numbers<[1], [0], [0], [1], [0, 0, 1, 1], [], []>} : vector<2x8xf32>, vector<8x8xf32>, vector<2x8xf32> -> vector<2x8xf32>
    %76 = tpu.reciprocal %75 {approx = true} : vector<2x8xf32> -> vector<2x8xf32>
    %77 = arith.mulf %65, %76 : vector<2x8xf32>
    %c0_22 = arith.constant 0 : index
    %c0_23 = arith.constant 0 : index
    %78 = vector.load %arg2[%c0_22, %c0_23] : memref<2x16xf32, #tpu.memory_space<vmem>>, vector<2x8xf32>
    tpu.vector_store %arg2[%c0_22, %c0_23], %41 {strides = array<i32>} : memref<2x16xf32, #tpu.memory_space<vmem>>, vector<2x8xf32>,
    %c0_24 = arith.constant 0 : index
    %c8_25 = arith.constant 8 : index
    %79 = vector.load %arg2[%c0_24, %c8_25] : memref<2x16xf32, #tpu.memory_space<vmem>>, vector<2x8xf32>
    tpu.vector_store %arg2[%c0_24, %c8_25], %77 {strides = array<i32>} : memref<2x16xf32, #tpu.memory_space<vmem>>, vector<2x8xf32>,
    return
  }
}

</mosaic_0001>

<bundles_post_ra>
// kernel: tpu_custom_call.1
= control target key start
LH: loop header
LB: loop body
LE: loop exit
PB: predicated region body
PF: predicated region fallthrough
CT: control target
= control target key end

     0   :  { %7 = vsyncpa [#allocation3], 0  ;;  %s1062_s0 = inlined_call_operand.hbm [shape: f32[2,128], index: 0, kind: input, shape index: {}]   ;;  %s1063_s1 = inlined_call_operand.hbm [shape: f32[16,128], index: 1, kind: input, shape index: {}]   ;;  %s1064_s2 = inlined_call_operand.hbm [shape: f32[2,16], index: 2, kind: output, shape index: {}]  }
   0x1   :  { %8 = vsyncpa [#allocation6], 0 }
   0x2   :  { %9 = vsyncpa [#allocation4], 0  ;;  %s900_s9 = smov [#allocation2]   ;;  %s901_s11 = smov [#allocation5]  }
   0x3   :  { %s16_s10 = sshll.u32 %s900_s9, 4  ;;  %s25_s12 = sshll.u32 %s901_s11, 4  ;;  %s17_s10 = int_to_ptr.vmem [resolvable:$true] %s16_s10  ;;  %s26_s12 = int_to_ptr.vmem [resolvable:$true] %s25_s12 }
   0x4   :  { %s842_s13 = scalar_lea.vmem %s17_s10, 32  ;;  %p847_p1 = scmp.lt.s32.totalorder %s17_s10, %s17_s10 }
   0x5   :  { %p843_p0 = scmp.ne.s32.totalorder %s17_s10, %s842_s13  ;;  %p848_p2 = scmp.lt.s32.totalorder %s842_s13, %s842_s13 }
   0x7   :  { %p849_p3 = por %p848_p2, %p847_p1 }
   0x9   :  { %p850_p4 = pnand %p849_p3, %p843_p0 }
   0xb   :  { %853 = shalt.err (!%p850_p4)
}
   0xc   :  { %19 = dma.hbm_to_vmem [thread:$0]  %s1062_s0, 32, %s17_s10, [#allocation3]  }
   0xd   :  { %s862_s16 = scalar_lea.vmem %s26_s12, 256  ;;  %p867_p6 = scmp.lt.s32.totalorder %s26_s12, %s26_s12 }
   0xe   :  { %p863_p5 = scmp.ne.s32.totalorder %s26_s12, %s862_s16  ;;  %p868_p7 = scmp.lt.s32.totalorder %s862_s16, %s862_s16 }
  0x10   :  { %p869_p8 = por %p868_p7, %p867_p6 }
  0x12   :  { %p870_p9 = pnand %p869_p8, %p863_p5 }
  0x14   :  { %873 = shalt.err (!%p870_p9)
}
  0x15   :  { %s902_s17 = smov 128   ;;  %s903_s18 = smov 8  }
  0x16   :  { %31 = dma.hbm_to_vmem [thread:$0]  %s1063_s1, 256, %s26_s12, [#allocation6], %s902_s17, %s902_s17, %s903_s18  }
  0x17   :  { %894 = dma.done.wait [#allocation3], 32  }
  0x18   :  { %895 = vsyncadd [#allocation3], 4294967264  ;;  %v43_v0 = vlaneseq }
  0x19   :  { %896 = dma.done.wait [#allocation6], 256  }
  0x1a   :  { %897 = vsyncadd [#allocation6], 4294967040  ;;  %v904_v1 = vmov 0.0   ;;  %v932_v2 = vshrl.u32 %v43_v0, 7  ;;  %vm905_vm0 = vmmov 0   ;;  %v938_v3 = vand.u32 127, %v43_v0 }
  0x1b   :  { %730 = vmatprep.subr.mxu0 %v904_v1  ;;  %765 = vmatprep.subr.mxu1 %v904_v1  ;;  %v906_v14 = vmov 1.0   ;;  %v38_v36 = vld [vmem:[#allocation2] sm:$0x3]  ;;  %v39_v49 = vld [vmem:[#allocation5] sm:$0xff]  ;;  %v682_v52 = vld [vmem:[#allocation5 + $0x8] ss:$0 sm:$0xff] }
  0x1c   :  { %762 = vmatprep.mubr.msk.f32.mxu0 %vm905_vm0, %v904_v1  ;;  %797 = vmatprep.mubr.msk.f32.mxu1 %vm905_vm0, %v904_v1  ;;  %v59_v4 = vadd.s32 120, %v932_v2  ;;  %v58_v5 = vadd.s32 112, %v932_v2  ;;  %v57_v6 = vadd.s32 104, %v932_v2  ;;  %v56_v7 = vadd.s32 96, %v932_v2  ;;  %v683_v56 = vld [vmem:[#allocation5 + $0x9] ss:$0 sm:$0xff] }
  0x1d   :  { %v55_v11 = vadd.s32 88, %v932_v2  ;;  %v54_v13 = vadd.s32 80, %v932_v2  ;;  %v53_v16 = vadd.s32 72, %v932_v2  ;;  %v52_v18 = vadd.s32 64, %v932_v2  ;;  %v684_v61 = vld [vmem:[#allocation5 + $0xa] ss:$0 sm:$0xff] }
  0x1e   :  { %v77_v8 = vand.u32 7, %v59_v4  ;;  %v76_v9 = vand.u32 7, %v58_v5  ;;  %v75_v10 = vand.u32 7, %v57_v6  ;;  %v74_v12 = vand.u32 7, %v56_v7  ;;  %s907_s0 = smov [#allocation7]  }
  0x1f   :  { %v73_v15 = vand.u32 7, %v55_v11  ;;  %v72_v17 = vand.u32 7, %v54_v13  ;;  %v71_v19 = vand.u32 7, %v53_v16  ;;  %v51_v20 = vadd.s32 56, %v932_v2  ;;  %s619_s1 = sshll.u32 %s907_s0, 4  ;;  %s620_s1 = int_to_ptr.vmem [resolvable:$true] %s619_s1 }
  0x20   :  { %vm93_vm1 = vcmp.eq.s32.totalorder %v77_v8, %v938_v3  ;;  %vm92_vm2 = vcmp.eq.s32.totalorder %v76_v9, %v938_v3  ;;  %vm91_vm3 = vcmp.eq.s32.totalorder %v75_v10, %v938_v3  ;;  %vm90_vm4 = vcmp.eq.s32.totalorder %v74_v12, %v938_v3  ;;  %s874_s21 = scalar_lea.vmem %s620_s1, 32  ;;  %p879_p11 = scmp.lt.s32.totalorder %s620_s1, %s620_s1 }
  0x21   :  { %731 = vmatpush3.msk.msra.mxu0 %vm93_vm1, %v906_v14  ;;  %766 = vmatpush3.msk.msra.mxu1 %vm93_vm1, %v906_v14  ;;  %vm89_vm5 = vcmp.eq.s32.totalorder %v73_v15, %v938_v3  ;;  %vm88_vm6 = vcmp.eq.s32.totalorder %v72_v17, %v938_v3  ;;  %v70_v21 = vand.u32 7, %v52_v18  ;;  %v50_v22 = vadd.s32 48, %v932_v2  ;;  %p875_p10 = scmp.ne.s32.totalorder %s620_s1, %s874_s21  ;;  %p880_p12 = scmp.lt.s32.totalorder %s874_s21, %s874_s21 }
  0x22   :  { %732 = vmatprep.subr.mxu0 %v904_v1  ;;  %767 = vmatprep.subr.mxu1 %v904_v1  ;;  %vm87_vm7 = vcmp.eq.s32.totalorder %v71_v19, %v938_v3  ;;  %v69_v23 = vand.u32 7, %v51_v20  ;;  %v49_v24 = vadd.s32 40, %v932_v2  ;;  %v48_v26 = vadd.s32 32, %v932_v2 }
  0x23   :  { %733 = vmatpush3.msk.msra.mxu0 %vm92_vm2, %v906_v14  ;;  %768 = vmatpush3.msk.msra.mxu1 %vm92_vm2, %v906_v14  ;;  %vm86_vm8 = vcmp.eq.s32.totalorder %v70_v21, %v938_v3  ;;  %v68_v25 = vand.u32 7, %v50_v22  ;;  %v47_v28 = vadd.s32 24, %v932_v2  ;;  %v46_v30 = vadd.s32 16, %v932_v2  ;;  %p881_p13 = por %p880_p12, %p879_p11 }
  0x24   :  { %734 = vmatprep.subr.mxu0 %v904_v1  ;;  %769 = vmatprep.subr.mxu1 %v904_v1  ;;  %vm85_vm9 = vcmp.eq.s32.totalorder %v69_v23, %v938_v3  ;;  %v67_v27 = vand.u32 7, %v49_v24  ;;  %v66_v29 = vand.u32 7, %v48_v26  ;;  %v45_v32 = vadd.s32 8, %v932_v2 }
  0x25   :  { %735 = vmatpush3.msk.msra.mxu0 %vm91_vm3, %v906_v14  ;;  %770 = vmatpush3.msk.msra.mxu1 %vm91_vm3, %v906_v14  ;;  %vm84_vm10 = vcmp.eq.s32.totalorder %v68_v25, %v938_v3  ;;  %v65_v31 = vand.u32 7, %v47_v28  ;;  %v64_v33 = vand.u32 7, %v46_v30  ;;  %v62_v35 = vand.u32 7, %v932_v2  ;;  %p882_p0 = pnand %p881_p13, %p875_p10 }
  0x26   :  { %736 = vmatprep.subr.mxu0 %v904_v1  ;;  %771 = vmatprep.subr.mxu1 %v904_v1  ;;  %vm83_vm11 = vcmp.eq.s32.totalorder %v67_v27, %v938_v3  ;;  %vm82_vm12 = vcmp.eq.s32.totalorder %v66_v29, %v938_v3  ;;  %v63_v34 = vand.u32 7, %v45_v32  ;;  %v200_v37 = vmul.f32 %v38_v36, %v38_v36 }
  0x27   :  { %737 = vmatpush3.msk.msra.mxu0 %vm90_vm4, %v906_v14  ;;  %772 = vmatpush3.msk.msra.mxu1 %vm90_vm4, %v906_v14  ;;  %vm81_vm13 = vcmp.eq.s32.totalorder %v65_v31, %v938_v3  ;;  %vm80_vm14 = vcmp.eq.s32.totalorder %v64_v33, %v938_v3  ;;  %vm78_vm1 = vcmp.eq.s32.totalorder %v62_v35, %v938_v3  ;;  %v126_v38 = vand.u32 7, %v938_v3 }
  0x28   :  { %738 = vmatprep.subr.mxu0 %v904_v1  ;;  %773 = vmatprep.subr.mxu1 %v904_v1  ;;  %vm79_vm15 = vcmp.eq.s32.totalorder %v63_v34, %v938_v3  ;;  %vm277_vm3 = vcmask 64512   ;;  %v510_v60 = vshra.s32 %v938_v3, 2  ;;  %v527_v7 = vshra.s32 %v932_v2, 2 }
  0x29   :  { %739 = vmatpush3.msk.msra.mxu0 %vm89_vm5, %v906_v14  ;;  %774 = vmatpush3.msk.msra.mxu1 %vm89_vm5, %v906_v14  ;;  %vm127_vm2 = vcmp.eq.s32.totalorder %v126_v38, %v932_v2  ;;  %vm513_vm5 = vcmask 58368  }
  0x2a   :  { %740 = vmatprep.subr.mxu0 %v904_v1  ;;  %775 = vmatprep.subr.mxu1 %v904_v1  ;;  %vm511_vm4 = vcmp.eq.s32.totalorder %v510_v60, 0 }
  0x2b   :  { %741 = vmatpush3.msk.msra.mxu0 %vm88_vm6, %v906_v14  ;;  %776 = vmatpush3.msk.msra.mxu1 %vm88_vm6, %v906_v14  ;;  %vm528_vm6 = vcmp.eq.s32.totalorder %v527_v7, %v510_v60 }
  0x2c   :  { %742 = vmatprep.subr.mxu0 %v904_v1  ;;  %777 = vmatprep.subr.mxu1 %v904_v1 }
  0x2d   :  { %743 = vmatpush3.msk.msra.mxu0 %vm87_vm7, %v906_v14  ;;  %778 = vmatpush3.msk.msra.mxu1 %vm87_vm7, %v906_v14  ;;  %vm611_vm7 = vcmask 123968  }
  0x2e   :  { %744 = vmatprep.subr.mxu0 %v904_v1  ;;  %779 = vmatprep.subr.mxu1 %v904_v1 }
  0x2f   :  { %745 = vmatpush3.msk.msra.mxu0 %vm86_vm8, %v906_v14  ;;  %780 = vmatpush3.msk.msra.mxu1 %vm86_vm8, %v906_v14 }
  0x30   :  { %746 = vmatprep.subr.mxu0 %v904_v1  ;;  %781 = vmatprep.subr.mxu1 %v904_v1 }
  0x31   :  { %747 = vmatpush3.msk.msra.mxu0 %vm85_vm9, %v906_v14  ;;  %782 = vmatpush3.msk.msra.mxu1 %vm85_vm9, %v906_v14 }
  0x32   :  { %748 = vmatprep.subr.mxu0 %v904_v1  ;;  %783 = vmatprep.subr.mxu1 %v904_v1 }
  0x33   :  { %749 = vmatpush3.msk.msra.mxu0 %vm84_vm10, %v906_v14  ;;  %784 = vmatpush3.msk.msra.mxu1 %vm84_vm10, %v906_v14 }
  0x34   :  { %750 = vmatprep.subr.mxu0 %v904_v1  ;;  %785 = vmatprep.subr.mxu1 %v904_v1 }
  0x35   :  { %751 = vmatpush3.msk.msra.mxu0 %vm83_vm11, %v906_v14  ;;  %786 = vmatpush3.msk.msra.mxu1 %vm83_vm11, %v906_v14 }
  0x36   :  { %752 = vmatprep.subr.mxu0 %v904_v1  ;;  %787 = vmatprep.subr.mxu1 %v904_v1 }
  0x37   :  { %753 = vmatpush3.msk.msra.mxu0 %vm82_vm12, %v906_v14  ;;  %788 = vmatpush3.msk.msra.mxu1 %vm82_vm12, %v906_v14 }
  0x38   :  { %754 = vmatprep.subr.mxu0 %v904_v1  ;;  %789 = vmatprep.subr.mxu1 %v904_v1 }
  0x39   :  { %755 = vmatpush3.msk.msra.mxu0 %vm81_vm13, %v906_v14  ;;  %790 = vmatpush3.msk.msra.mxu1 %vm81_vm13, %v906_v14 }
  0x3a   :  { %756 = vmatprep.subr.mxu0 %v904_v1  ;;  %791 = vmatprep.subr.mxu1 %v904_v1 }
  0x3b   :  { %757 = vmatpush3.msk.msra.mxu0 %vm80_vm14, %v906_v14  ;;  %792 = vmatpush3.msk.msra.mxu1 %vm80_vm14, %v906_v14 }
  0x3c   :  { %758 = vmatprep.subr.mxu0 %v904_v1  ;;  %793 = vmatprep.subr.mxu1 %v904_v1 }
  0x3d   :  { %759 = vmatpush3.msk.msra.mxu0 %vm79_vm15, %v906_v14  ;;  %794 = vmatpush3.msk.msra.mxu1 %vm79_vm15, %v906_v14 }
  0x3e   :  { %760 = vmatprep.subr.mxu0 %v904_v1  ;;  %795 = vmatprep.subr.mxu1 %v904_v1 }
  0x3f   :  { %761 = vmatpush3.msk.msra.mxu0 %vm78_vm1, %v906_v14  ;;  %796 = vmatpush3.msk.msra.mxu1 %vm78_vm1, %v906_v14 }
  0x40   :  { %763 = vmatmul.mubr.f32.vlgmr.msra.gmra.mxu0 %v38_v36  ;;  %798 = vmatmul.mubr.f32.vlgmr.msra.gmra.mxu1 %v200_v37 }
  0x41   :  { %800 = vmatprep.subr.mxu0 %v904_v1  ;;  %802 = vmatprep.mubr.msk.f32.mxu0 %vm905_vm0, %v904_v1 }
  0x42   :  { %805 = vmatprep.subr.mxu1 %v904_v1  ;;  %807 = vmatprep.mubr.msk.f32.mxu1 %vm905_vm0, %v904_v1 }
  0x43   :  { %801 = vmatpush3.msk.msra.mxu0 %vm127_vm2, %v906_v14  ;;  %806 = vmatpush3.msk.msra.mxu1 %vm127_vm2, %v906_v14 }
  0x44   :  { %810 = vmatprep.subr.mxu0 %v904_v1  ;;  %815 = vmatprep.subr.mxu1 %v904_v1 }
 0x100   :  { %v196_v39 = vpop.f32.mrf.mxu0  ;;  %v267_v40 = vpop.f32.mrf.mxu1 }
 0x101   :  { %v271_v41 = vmul.f32 0.0625, %v196_v39  ;;  %v272_v42 = vmul.f32 0.0625, %v267_v40 }
 0x102   :  { %v764_v43 = vpop.f32.mrf.mxu0  ;;  %v799_v44 = vpop.f32.mrf.mxu1 }
 0x103   :  { %v273_v45 = vmul.f32 %v271_v41, %v271_v41  ;;  %803 = vmatmul.mubr.msk.f32.vlgmr.msra.gmra.mxu0 %vm277_vm3, %v271_v41 }
 0x104   :  { %812 = vmatprep.mubr.msk.f32.mxu0 %vm905_vm0, %v904_v1  ;;  %811 = vmatpush3.xpose.msra.mxu0 %v39_v49 }
 0x105   :  { %v274_v46 = vsub.f32 %v272_v42, %v273_v45 }
 0x107   :  { %v275_v47 = vadd.f32 1e-05, %v274_v46 }
 0x109   :  { %828 = vrsqrt.f32 %v275_v47 }
 0x116   :  { %v829_v48 = vpop.eup %828 }
 0x117   :  { %808 = vmatmul.mubr.msk.f32.vlgmr.msra.gmra.mxu1 %vm277_vm3, %v829_v48 }
 0x118   :  { %817 = vmatprep.mubr.msk.f32.mxu1 %vm905_vm0, %v904_v1  ;;  %vm518_vm0 = vcmp.eq.s32.totalorder %v510_v60, 1  ;;  %816 = vmatpush3.msk.msra.mxu1 %vm528_vm6, %v906_v14 }
 0x1c3   :  { %v347_v50 = vpop.f32.mrf.mxu0 }
 0x1c4   :  { %v424_v54 = vsub.f32 %v38_v36, %v347_v50 }
 0x1c5   :  { %v804_v51 = vpop.f32.mrf.mxu0 }
 0x1d7   :  { %v420_v53 = vpop.f32.mrf.mxu1 }
 0x1d8   :  { %v429_v55 = vmul.f32 %v682_v52, %v420_v53 }
 0x1d9   :  { %v809_v57 = vpop.f32.mrf.mxu1 }
 0x1da   :  { %v430_v58 = vmul.f32 %v429_v55, %v424_v54 }
 0x1dc   :  { %v435_v59 = vadd.f32 %v683_v56, %v430_v58 }
 0x1de   :  { %813 = vmatmul.mubr.f32.vlgmr.msra.gmra.mxu0 %v435_v59 }
 0x29e   :  { %v506_v62 = vpop.f32.mrf.mxu0 }
 0x29f   :  { %v507_v63 = vadd.f32 %v684_v61, %v506_v62 }
 0x2a0   :  { %v814_v0 = vpop.f32.mrf.mxu0 }
 0x2a1   :  { %v512_v1 = vsel %vm511_vm4, %v507_v63, -1e+30  ;;  %606 = vst.msk [vmem:[#allocation7] sm:$0x3] %vm513_vm5, %v507_v63  ;;  %v519_v5 = vsel %vm518_vm0, %v507_v63, -1e+30 }
 0x2a2   :  { %v514_v4 = vsel %vm513_vm5, %v512_v1, -inf  ;;  %v520_v6 = vsel %vm513_vm5, %v519_v5, -inf }
 0x2a3   :  { %515 = vmax.xlane.f32.xlu0 %v514_v4 }
 0x2a7   :  { %521 = vmax.xlane.f32.xlu0 %v520_v6 }
 0x32c   :  { %v516_v3 = vpop.xlane.xlu0 %515 }
 0x32d   :  { %v517_v8 = vsel %vm511_vm4, %v516_v3, 0.0 }
 0x330   :  { %v522_v9 = vpop.xlane.xlu0 %521 }
 0x331   :  { %v523_v10 = vsel %vm518_vm0, %v522_v9, %v517_v8 }
 0x332   :  { %v524_v11 = vsub.f32 %v507_v63, %v523_v10 }
 0x334   :  { %v525_v12 = vmul.f32 1.442695, %v524_v11 }
 0x336   :  { %830 = vpow2.f32 %v525_v12 }
 0x343   :  { %v831_v13 = vpop.eup %830 }
 0x344   :  { %818 = vmatmul.mubr.msk.f32.vlgmr.msra.gmra.mxu1 %vm277_vm3, %v831_v13 }
 0x404   :  { %v600_v15 = vpop.f32.mrf.mxu1 }
 0x405   :  { %832 = vrcp.f32 %v600_v15 }
 0x406   :  { %v819_v16 = vpop.f32.mrf.mxu1 }
 0x412   :  { %v833_v17 = vpop.eup %832 }
 0x413   :  { %v605_v18 = vmul.f32 %v833_v17, %v831_v13 }
 0x415   :  { %608 = vrot.lane.b32.xlu1 %v605_v18, %s903_s18 }
 0x487   :  { %v609_v2 = vpop.permute.xlu1 %608 }
 0x488   :  { %612 = vst.msk [vmem:[#allocation7] sm:$0x3] %vm611_vm7, %v609_v2 }
 0x489   :  { %885 = shalt.err (!%p882_p0)
}
 0x48a   :  { %622 = dma.vmem_to_hbm [thread:$0]  %s620_s1, 32, %s1064_s2, [#allocation4]  }
 0x48b   :  { %898 = dma.done.wait [#allocation4], 32  }
 0x48c   :  { %899 = vsyncadd [#allocation4], 4294967264 }
 0x48d   :  { %626 = vsyncpa [#allocation3], 1 }
 0x48e   :  { %627 = vsyncpa [#allocation6], 1 }
 0x48f   :  { %628 = vsyncpa [#allocation4], 1 }

</bundles_post_ra>
